<compile_context>
chip_gen: v7x
topology: tpu7x:2x2x1
jax: 0.10.0
libtpu: 0.0.40
codegen_flags: <defaults>
</compile_context>

<pallas_src>
import jax
import jax.numpy as jnp
from jax.experimental import pallas as pl
from jax.experimental.pallas import tpu as pltpu

D_IN, H1, H2, D_OUT = 784, 128, 64, 10
H2_PAD = 128        # lane-dense hidden-2 (64 -> 128, zero-padded)
D_OUT_PAD = 128     # lane-dense output store; real logits are [:, :10]


def _round_up(x, m):
    return ((x + m - 1) // m) * m


def mlp_kernel(x_ref, w1_ref, b1_ref, w2_ref, b2_ref, w3_ref, b3_ref, o_ref):
    # x arrives in its native dtype (f32 here); cast to bf16 right before the MXU
    # so the HBM read stays un-duplicated and the cast uses idle VALU slots.
    x = x_ref[...].astype(jnp.bfloat16)
    # layer 1: bf16 x bf16 -> f32 accumulate on the MXU; bias + ReLU in f32
    h1 = jnp.dot(x, w1_ref[...], preferred_element_type=jnp.float32)
    h1 = jnp.maximum(h1 + b1_ref[...], 0.0)
    # layer 2
    h2 = jnp.dot(h1.astype(jnp.bfloat16), w2_ref[...],
                 preferred_element_type=jnp.float32)
    h2 = jnp.maximum(h2 + b2_ref[...], 0.0)
    # output layer (linear); store bf16 to halve the writeback traffic
    out = jnp.dot(h2.astype(jnp.bfloat16), w3_ref[...],
                  preferred_element_type=jnp.float32)
    o_ref[...] = (out + b3_ref[...]).astype(o_ref.dtype)


def _prepare_params(params):
    """Pad + cast parameters for the kernel (done once, outside the kernel)."""
    w1 = params["w1"].astype(jnp.bfloat16)                                    # (784, 128)
    w2 = jnp.pad(params["w2"], ((0, 0), (0, H2_PAD - H2))).astype(jnp.bfloat16)
    w3 = jnp.pad(params["w3"],
                 ((0, H2_PAD - H2), (0, D_OUT_PAD - D_OUT))).astype(jnp.bfloat16)
    b1 = params["b1"].astype(jnp.float32)
    b2 = jnp.pad(params["b2"], ((0, 0), (0, H2_PAD - H2))).astype(jnp.float32)
    b3 = jnp.pad(params["b3"], ((0, 0), (0, D_OUT_PAD - D_OUT))).astype(jnp.float32)
    return w1, b1, w2, b2, w3, b3


def _resident_spec(shape, index_map):
    """Weight/bias spec: constant index_map, single-buffered (never re-fetched)."""
    if hasattr(pl, "Buffered"):
        try:
            return pl.BlockSpec(shape, index_map, pipeline_mode=pl.Buffered(1))
        except TypeError:
            pass
    return pl.BlockSpec(shape, index_map)


def digit_classifier_forward(x, params, *, batch_tile=1024):
    """x: (B, 784) in float32 (or bfloat16).  params: dict of w1,b1,w2,b2,w3,b3
    (f32, (in,out) layout).

    The batch tile defaults to 1024 rows (amortizes per-grid-step overhead; x tile =
    1024x784 f32 ~= 3 MiB double-buffered, well inside every generation's scoped-VMEM
    limit once vmem_limit_bytes=32 MiB is set).  For smaller batches the tile is shrunk
    so there are always >= 2 grid steps when possible, letting v7x shard the batch
    across its two TensorCores.
    """
    B = x.shape[0]
    # >= 2 grid steps for any batch with more than 8 rows; tile is a multiple of 8.
    tile = min(batch_tile, max(8, _round_up(pl.cdiv(B, 2), 8)))
    B_pad = _round_up(B, tile)
    grid = (B_pad // tile,)

    if B_pad != B:
        # batch pad only (no dtype or lane pad); skipped entirely for aligned batches
        x = jnp.pad(x, ((0, B_pad - B), (0, 0)))

    w1, b1, w2, b2, w3, b3 = _prepare_params(params)

    def x_map(i):
        return (i, 0)

    def full_map(i):
        return (0, 0)

    out = pl.pallas_call(
        mlp_kernel,
        out_shape=jax.ShapeDtypeStruct((B_pad, D_OUT_PAD), jnp.bfloat16),
        grid_spec=pltpu.PrefetchScalarGridSpec(
            num_scalar_prefetch=0,
            grid=grid,
            in_specs=[
                pl.BlockSpec((tile, D_IN), x_map),                 # x tile, native dtype
                _resident_spec((D_IN, H1), full_map),              # w1 (resident)
                _resident_spec((1, H1), full_map),                 # b1
                _resident_spec((H1, H2_PAD), full_map),            # w2
                _resident_spec((1, H2_PAD), full_map),             # b2
                _resident_spec((H2_PAD, D_OUT_PAD), full_map),     # w3
                _resident_spec((1, D_OUT_PAD), full_map),          # b3
            ],
            out_specs=pl.BlockSpec((tile, D_OUT_PAD), x_map),
        ),
        compiler_params=pltpu.CompilerParams(
            dimension_semantics=("parallel",),   # batch axis shards across TCs (v7x)
            vmem_limit_bytes=32 * 1024 * 1024,   # headroom for larger tiles on v5e
        ),
    )(x, w1, b1, w2, b2, w3, b3)

    # only 20 B/row of bf16 is re-read here (was 512 B/row of f32)
    return out[:B, :D_OUT].astype(jnp.float32)


def init_params(key):
    """Deterministic synthetic parameters matching nn.Linear shapes
    (stored transposed: (in, out) instead of torch's (out, in))."""
    ks = jax.random.split(key, 6)

    def linear(kw, kb, fan_in, fan_out):
        bound = 1.0 / jnp.sqrt(fan_in)  # same scale as torch's default init
        w = jax.random.uniform(kw, (fan_in, fan_out), jnp.float32, -bound, bound)
        b = jax.random.uniform(kb, (1, fan_out), jnp.float32, -bound, bound)
        return w, b

    w1, b1 = linear(ks[0], ks[1], D_IN, H1)
    w2, b2 = linear(ks[2], ks[3], H1, H2)
    w3, b3 = linear(ks[4], ks[5], H2, D_OUT)
    return dict(w1=w1, b1=b1, w2=w2, b2=b2, w3=w3, b3=b3)


def reference_forward(x, p):
    """Pure-JAX reference with the same bf16-input / f32-accumulate compute."""
    bf = jnp.bfloat16
    h1 = jnp.maximum(jnp.dot(x.astype(bf), p["w1"].astype(bf),
                             preferred_element_type=jnp.float32) + p["b1"], 0.0)
    h2 = jnp.maximum(jnp.dot(h1.astype(bf), p["w2"].astype(bf),
                             preferred_element_type=jnp.float32) + p["b2"], 0.0)
    return jnp.dot(h2.astype(bf), p["w3"].astype(bf),
                   preferred_element_type=jnp.float32) + p["b3"]


if __name__ == "__main__":
    key = jax.random.PRNGKey(0)
    k_x, k_p = jax.random.split(key)

    B = 32  # small demo batch; wrapper picks tile=16 -> 2 grid steps
    x = jax.random.normal(k_x, (B, D_IN), dtype=jnp.float32)
    params = init_params(k_p)

    out = digit_classifier_forward(x, params)
    out = jax.block_until_ready(out)

    ref = reference_forward(x, params)
    assert out.shape == (B, D_OUT)
    # kernel output passes through a bf16 store -> allow ~0.5% relative slack
    assert jnp.allclose(out, ref, atol=2e-2, rtol=2e-2), "mismatch vs JAX reference"

    print("KERNEL_OK")
</pallas_src>

<mosaic_0001>
module attributes {stable_mosaic.version = 11 : i64} {
  func.func @mlp_kernel(%arg0: i32, %arg1: memref<16x784xf32, #tpu.memory_space<vmem>>, %arg2: memref<784x128xbf16, #tpu.memory_space<vmem>>, %arg3: memref<1x128xf32, #tpu.memory_space<vmem>>, %arg4: memref<128x128xbf16, #tpu.memory_space<vmem>>, %arg5: memref<1x128xf32, #tpu.memory_space<vmem>>, %arg6: memref<128x128xbf16, #tpu.memory_space<vmem>>, %arg7: memref<1x128xf32, #tpu.memory_space<vmem>>, %arg8: memref<16x128xbf16, #tpu.memory_space<vmem>>) attributes {dimension_semantics = [#tpu.dimension_semantics<parallel>], iteration_bounds = array<i64: 2>, scalar_prefetch = 0 : i64, scratch_operands = 0 : i64, tpu.core_type = #tpu.core_type<tc>, window_params = [{transform_indices = @transform_0, window_bounds = array<i64: 16, 784>}, {pipeline_mode = #tpu.pipeline_mode<synchronous>, transform_indices = @transform_1, window_bounds = array<i64: 784, 128>}, {pipeline_mode = #tpu.pipeline_mode<synchronous>, transform_indices = @transform_2, window_bounds = array<i64: 1, 128>}, {pipeline_mode = #tpu.pipeline_mode<synchronous>, transform_indices = @transform_3, window_bounds = array<i64: 128, 128>}, {pipeline_mode = #tpu.pipeline_mode<synchronous>, transform_indices = @transform_4, window_bounds = array<i64: 1, 128>}, {pipeline_mode = #tpu.pipeline_mode<synchronous>, transform_indices = @transform_5, window_bounds = array<i64: 128, 128>}, {pipeline_mode = #tpu.pipeline_mode<synchronous>, transform_indices = @transform_6, window_bounds = array<i64: 1, 128>}, {transform_indices = @transform_7, window_bounds = array<i64: 16, 128>}]} {
    %c0 = arith.constant 0 : index
    %c0_0 = arith.constant 0 : index
    %0 = vector.load %arg1[%c0, %c0_0] : memref<16x784xf32, #tpu.memory_space<vmem>>, vector<16x784xf32>
    %1 = arith.truncf %0 : vector<16x784xf32> to vector<16x784xbf16>
    %c0_1 = arith.constant 0 : index
    %c0_2 = arith.constant 0 : index
    %2 = vector.load %arg2[%c0_1, %c0_2] : memref<784x128xbf16, #tpu.memory_space<vmem>>, vector<784x128xbf16>
    %cst = arith.constant dense<0.000000e+00> : vector<16x128xf32>
    %3 = tpu.matmul %1, %2, %cst {dimension_numbers = #tpu.dot_dimension_numbers<[1], [0], [0], [1], [0, 0, 1, 1], [], []>} : vector<16x784xbf16>, vector<784x128xbf16>, vector<16x128xf32> -> vector<16x128xf32>
    %c0_3 = arith.constant 0 : index
    %c0_4 = arith.constant 0 : index
    %4 = vector.load %arg3[%c0_3, %c0_4] : memref<1x128xf32, #tpu.memory_space<vmem>>, vector<1x128xf32>
    %5 = vector.broadcast %4 : vector<1x128xf32> to vector<16x128xf32>
    %6 = arith.addf %3, %5 : vector<16x128xf32>
    %cst_5 = arith.constant 0.000000e+00 : f32
    %7 = vector.broadcast %cst_5 : f32 to vector<16x128xf32>
    %8 = arith.maximumf %6, %7 : vector<16x128xf32>
    %9 = arith.truncf %8 : vector<16x128xf32> to vector<16x128xbf16>
    %c0_6 = arith.constant 0 : index
    %c0_7 = arith.constant 0 : index
    %10 = vector.load %arg4[%c0_6, %c0_7] : memref<128x128xbf16, #tpu.memory_space<vmem>>, vector<128x128xbf16>
    %cst_8 = arith.constant dense<0.000000e+00> : vector<16x128xf32>
    %11 = tpu.matmul %9, %10, %cst_8 {dimension_numbers = #tpu.dot_dimension_numbers<[1], [0], [0], [1], [0, 0, 1, 1], [], []>} : vector<16x128xbf16>, vector<128x128xbf16>, vector<16x128xf32> -> vector<16x128xf32>
    %c0_9 = arith.constant 0 : index
    %c0_10 = arith.constant 0 : index
    %12 = vector.load %arg5[%c0_9, %c0_10] : memref<1x128xf32, #tpu.memory_space<vmem>>, vector<1x128xf32>
    %13 = vector.broadcast %12 : vector<1x128xf32> to vector<16x128xf32>
    %14 = arith.addf %11, %13 : vector<16x128xf32>
    %cst_11 = arith.constant 0.000000e+00 : f32
    %15 = vector.broadcast %cst_11 : f32 to vector<16x128xf32>
    %16 = arith.maximumf %14, %15 : vector<16x128xf32>
    %17 = arith.truncf %16 : vector<16x128xf32> to vector<16x128xbf16>
    %c0_12 = arith.constant 0 : index
    %c0_13 = arith.constant 0 : index
    %18 = vector.load %arg6[%c0_12, %c0_13] : memref<128x128xbf16, #tpu.memory_space<vmem>>, vector<128x128xbf16>
    %cst_14 = arith.constant dense<0.000000e+00> : vector<16x128xf32>
    %19 = tpu.matmul %17, %18, %cst_14 {dimension_numbers = #tpu.dot_dimension_numbers<[1], [0], [0], [1], [0, 0, 1, 1], [], []>} : vector<16x128xbf16>, vector<128x128xbf16>, vector<16x128xf32> -> vector<16x128xf32>
    %c0_15 = arith.constant 0 : index
    %c0_16 = arith.constant 0 : index
    %20 = vector.load %arg7[%c0_15, %c0_16] : memref<1x128xf32, #tpu.memory_space<vmem>>, vector<1x128xf32>
    %21 = vector.broadcast %20 : vector<1x128xf32> to vector<16x128xf32>
    %22 = arith.addf %19, %21 : vector<16x128xf32>
    %23 = arith.truncf %22 : vector<16x128xf32> to vector<16x128xbf16>
    %c0_17 = arith.constant 0 : index
    %c0_18 = arith.constant 0 : index
    %24 = vector.load %arg8[%c0_17, %c0_18] : memref<16x128xbf16, #tpu.memory_space<vmem>>, vector<16x128xbf16>
    tpu.vector_store %arg8[%c0_17, %c0_18], %23 {strides = array<i32>} : memref<16x128xbf16, #tpu.memory_space<vmem>>, vector<16x128xbf16>,
    return
  }
  func.func @transform_0(%arg0: i32) -> (i32, i32) {
    %c0_i32 = arith.constant 0 : i32
    %c0_i32_0 = arith.constant 0 : i32
    return %arg0, %c0_i32 : i32, i32
  }
  func.func @transform_1(%arg0: i32) -> (i32, i32) {
    %c0_i32 = arith.constant 0 : i32
    %c0_i32_0 = arith.constant 0 : i32
    %c0_i32_1 = arith.constant 0 : i32
    return %c0_i32, %c0_i32_0 : i32, i32
  }
  func.func @transform_2(%arg0: i32) -> (i32, i32) {
    %c0_i32 = arith.constant 0 : i32
    %c0_i32_0 = arith.constant 0 : i32
    %c0_i32_1 = arith.constant 0 : i32
    return %c0_i32, %c0_i32_0 : i32, i32
  }
  func.func @transform_3(%arg0: i32) -> (i32, i32) {
    %c0_i32 = arith.constant 0 : i32
    %c0_i32_0 = arith.constant 0 : i32
    %c0_i32_1 = arith.constant 0 : i32
    return %c0_i32, %c0_i32_0 : i32, i32
  }
  func.func @transform_4(%arg0: i32) -> (i32, i32) {
    %c0_i32 = arith.constant 0 : i32
    %c0_i32_0 = arith.constant 0 : i32
    %c0_i32_1 = arith.constant 0 : i32
    return %c0_i32, %c0_i32_0 : i32, i32
  }
  func.func @transform_5(%arg0: i32) -> (i32, i32) {
    %c0_i32 = arith.constant 0 : i32
    %c0_i32_0 = arith.constant 0 : i32
    %c0_i32_1 = arith.constant 0 : i32
    return %c0_i32, %c0_i32_0 : i32, i32
  }
  func.func @transform_6(%arg0: i32) -> (i32, i32) {
    %c0_i32 = arith.constant 0 : i32
    %c0_i32_0 = arith.constant 0 : i32
    %c0_i32_1 = arith.constant 0 : i32
    return %c0_i32, %c0_i32_0 : i32, i32
  }
  func.func @transform_7(%arg0: i32) -> (i32, i32) {
    %c0_i32 = arith.constant 0 : i32
    %c0_i32_0 = arith.constant 0 : i32
    return %arg0, %c0_i32 : i32, i32
  }
}

</mosaic_0001>

<bundles_post_ra>
// kernel: tpu_custom_call.1
= control target key start
LH: loop header
LB: loop body
LE: loop exit
PB: predicated region body
PF: predicated region fallthrough
CT: control target
= control target key end

     0   :  { %12 = vsyncpa [#allocation3], 0  ;;  %s2232_s0 = inlined_call_operand.hbm [shape: f32[32,784], index: 0, kind: input, shape index: {}]   ;;  %s2233_s1 = inlined_call_operand.hbm [shape: bf16[784,128], index: 1, kind: input, shape index: {}]   ;;  %s2234_s2 = inlined_call_operand.vmem [shape: f32[1,128], index: 2, kind: input, shape index: {}]   ;;  %s2235_s3 = inlined_call_operand.hbm [shape: bf16[128,128], index: 3, kind: input, shape index: {}]   ;;  %s2236_s4 = inlined_call_operand.vmem [shape: f32[1,128], index: 4, kind: input, shape index: {}]   ;;  %s2237_s5 = inlined_call_operand.hbm [shape: bf16[128,128], index: 5, kind: input, shape index: {}]   ;;  %s2238_s6 = inlined_call_operand.vmem [shape: f32[1,128], index: 6, kind: input, shape index: {}]   ;;  %s2239_s7 = inlined_call_operand.hbm [shape: bf16[32,128], index: 7, kind: output, shape index: {}]  }
   0x1   :  { %14 = vsyncpa [#allocation3 + $0x1], 0 }
   0x2   :  { %15 = vsyncpa [#allocation6], 0 }
   0x3   :  { %16 = vsyncpa [#allocation9], 0 }
   0x4   :  { %17 = vsyncpa [#allocation4], 0 }
   0x5   :  { %19 = vsyncpa [#allocation4 + $0x1], 0  ;;  %s1915_s24 = smov 0   ;;  %s1917_s25 = smov 0  }
   0x6   :  { %s1919_s26 = smov 0   ;;  %s1921_s27 = smov 0  }
   0x7 LB: > { %s1936_s28 = sadd.s32 4294967295, %s1860_s27   ;;  %s1289_s29 = sadd.s32 4294967294, %s1860_s27   ;;  %s1860_s27 = sphi %s1921_s27, %s2265_s27   ;;  %s1856_s26 = sphi %s1919_s26, %s2264_s26   ;;  %s1852_s25 = sphi %s1917_s25, %s2263_s25   ;;  %s1848_s24 = sphi %s1915_s24, %s2262_s24  }
   0x8   : > { %p45_p0 = scmp.ne.s32.totalorder %s1852_s25, %s1848_s24  ;;  %p2240_p1 = scmp.eq.s32.totalorder %s1936_s28, 0 }
   0x9   : > { %p201_p3 = scmp.eq.s32.totalorder %s1289_s29, 1  ;;  %p1290_p5 = scmp.ge.s32.totalorder %s1860_s27, 1 }
   0xa   : > { %p1945_p4 = por %p2240_p1, %p45_p0  ;;  %p208_p7 = scmp.lt.s32.totalorder %s1860_s27, 3 }
   0xb   : > { %p1950_p6 = por %p201_p3, %p45_p0  ;;  %s1862_s10 = smov [#allocation5]  }
   0xc   : > { %s2244_s30 = scalar_select %p1945_p4, 1, 0 }
   0xd   : > { %s2245_s8 = scalar_select %p1950_p6, 1, 0 }
   0xe   : > { %p1955_p8 = pnand %p1290_p5, %p208_p7  ;;  %s220_s11 = sshll.u32 %s1862_s10, 4  ;;  %s1959_s11 = int_to_ptr.vmem [resolvable:$true] %s220_s11 }
   0xf   : > { %2246 = sst [smem:[#allocation15_spill]] %s2245_s8  ;;  %s1863_s13 = smov [#allocation7]  }
  0x10   : > { %s2247_s9 = scalar_select %p1955_p8, 1, 0 }
  0x11   : > { %p1538_p9 = pneg %p1955_p8  ;;  %s236_s14 = sshll.u32 %s1863_s13, 4  ;;  %s1970_s14 = int_to_ptr.vmem [resolvable:$true] %s236_s14 }
  0x12   : > { %s1864_s15 = smov [#allocation8]   ;;  %s1672_s19 = scalar_lea.hbm %s2233_s1, 6272 }
  0x13   : > { %p1966_p11 = pnand %p1538_p9, %p2240_p1  ;;  %s1972_s16 = sshll.u32 %s1864_s15, 4  ;;  %s253_s16 = int_to_ptr.vmem [resolvable:$true] %s1972_s16 }
  0x14   : > { %p1673_p12 = scmp.ne.s32.totalorder %s2233_s1, %s1672_s19  ;;  %p1679_p5 = scmp.lt.u32.totalorder %s1672_s19, %s2233_s1 }
  0x15   : > { %p1982_p13 = pneg %p1966_p11 }
  0x17   : > { %p1675_p0 = pnand %p1982_p13, %p1673_p12 }
  0x19   : > { %p1676_p3 = pneg %p1675_p0 }
  0x1b   : > { %p1681_p7 = pnand %p1679_p5, %p1676_p3 }
  0x1d   : > { %1684 = shalt.err (!%p1681_p7)
}
  0x1e   : > { %s1685_s10 = scalar_lea.vmem %s1959_s11, 6272  ;;  %p1693_p2 = scmp.lt.s32.totalorder %s1959_s11, %s1959_s11 }
  0x1f   : > { %p1686_p9 = scmp.ne.s32.totalorder %s1959_s11, %s1685_s10  ;;  %p1694_p6 = scmp.lt.s32.totalorder %s1685_s10, %s1685_s10 }
  0x21   : > { %p1688_p10 = pnand %p1686_p9, %p1982_p13  ;;  %p1695_p12 = por %p1694_p6, %p1693_p2 }
  0x23   : > { %p1689_p1 = pneg %p1688_p10 }
  0x25   : > { %p1696_p0 = pnand %p1695_p12, %p1689_p1 }
  0x27   : > { %1699 = shalt.err (!%p1696_p0)
}
  0x28   : > { %s1865_s13 = smov 64   ;;  %s1866_s15 = smov 4  }
  0x29   : > { %1541 = dma.hbm_to_vmem [thread:$0]  (!%p1966_p11), %s2233_s1, 6272, %s1959_s11, [#allocation6], %s1865_s13, %s1865_s13, %s1866_s15  }
  0x2a   : > { %s1700_s21 = scalar_lea.hbm %s2235_s3, 1024 }
  0x2b   : > { %p1701_p1 = scmp.ne.s32.totalorder %s2235_s3, %s1700_s21  ;;  %p1707_p10 = scmp.lt.u32.totalorder %s1700_s21, %s2235_s3 }
  0x2d   : > { %p1703_p2 = pnand %p1701_p1, %p1982_p13 }
  0x2f   : > { %p1704_p6 = pneg %p1703_p2 }
  0x31   : > { %p1709_p3 = pnand %p1707_p10, %p1704_p6 }
  0x33   : > { %1712 = shalt.err (!%p1709_p3)
}
  0x34   : > { %s1713_s11 = scalar_lea.vmem %s1970_s14, 1024  ;;  %p1721_p12 = scmp.lt.s32.totalorder %s1970_s14, %s1970_s14 }
  0x35   : > { %p1714_p5 = scmp.ne.s32.totalorder %s1970_s14, %s1713_s11  ;;  %p1722_p0 = scmp.lt.s32.totalorder %s1713_s11, %s1713_s11 }
  0x37   : > { %p1716_p7 = pnand %p1714_p5, %p1982_p13  ;;  %p1723_p1 = por %p1722_p0, %p1721_p12 }
  0x39   : > { %p1717_p9 = pneg %p1716_p7 }
  0x3b   : > { %p1724_p2 = pnand %p1723_p1, %p1717_p9 }
  0x3d   : > { %1727 = shalt.err (!%p1724_p2)
}
  0x3e   : > { %1544 = dma.hbm_to_vmem [thread:$0]  (!%p1966_p11), %s2235_s3, 1024, %s1970_s14, [#allocation6], %s1865_s13, %s1865_s13, %s1866_s15  }
  0x3f   : > { %s1728_s20 = scalar_lea.hbm %s2237_s5, 1024 }
  0x40   : > { %p1729_p6 = scmp.ne.s32.totalorder %s2237_s5, %s1728_s20  ;;  %p1735_p5 = scmp.lt.u32.totalorder %s1728_s20, %s2237_s5 }
  0x42   : > { %p1731_p10 = pnand %p1729_p6, %p1982_p13 }
  0x44   : > { %p1732_p3 = pneg %p1731_p10 }
  0x46   : > { %p1737_p7 = pnand %p1735_p5, %p1732_p3 }
  0x48   : > { %1740 = shalt.err (!%p1737_p7)
}
  0x49   : > { %s1741_s11 = scalar_lea.vmem %s253_s16, 1024  ;;  %p1749_p1 = scmp.lt.s32.totalorder %s253_s16, %s253_s16 }
  0x4a   : > { %p1742_p9 = scmp.ne.s32.totalorder %s253_s16, %s1741_s11  ;;  %p1750_p2 = scmp.lt.s32.totalorder %s1741_s11, %s1741_s11 }
  0x4c   : > { %p1744_p12 = pnand %p1742_p9, %p1982_p13  ;;  %p1751_p4 = por %p1750_p2, %p1749_p1 }
  0x4e   : > { %p1745_p0 = pneg %p1744_p12 }
  0x50   : > { %p1752_p8 = pnand %p1751_p4, %p1745_p0 }
  0x52   : > { %1755 = shalt.err (!%p1752_p8)
}
  0x53   : > { %1547 = dma.hbm_to_vmem [thread:$0]  (!%p1966_p11), %s2237_s5, 1024, %s253_s16, [#allocation9], %s1865_s13, %s1865_s13, %s1866_s15  }
  0x54   : > { %s2055_s22 = sadd.s32 1, %s1860_s27   ;;  %s32_s17 = sadd.s32 1, %s1856_s26 }
  0x55   : > { %s29_s12 = ssub.s32 %s1860_s27, %s2055_s22  ;;  %p39_p8 = scmp.ne.s32.totalorder %s1856_s26, %s1852_s25 }
  0x56   : > { %p30_p4 = scmp.eq.s32.totalorder %s29_s12, 0  ;;  %p40_p13 = scmp.eq.s32.totalorder %s1860_s27, 0 }
  0x57   : > { %p1559_p6 = scmp.lt.s32.totalorder %s1860_s27, 2  ;;  %p2250_p3 = scmp.eq.s32.totalorder %s1936_s28, 1 }
  0x58   : > { %s2065_s18 = scalar_select %p30_p4, %s1856_s26, %s32_s17  }
  0x59   : > { %p41_p10 = por %p40_p13, %p39_p8  ;;  %p2069_p5 = por %p2250_p3, %p39_p8 }
  0x5a   : > { %s269_s20 = sand.u32 1, %s1856_s26   ;;  %s1520_s21 = smul.u32 1792, %s1860_s27 }
  0x5b   : > { %s1519_s16 = smul.u32 112, %s269_s20  ;;  %p2080_p11 = pnand %p1559_p6, %p41_p10 }
  0x5c   : > { %s2078_s23 = scalar_lea.hbm %s2232_s0, %s1520_s21  ;;  %s2086_s14 = scalar_lea.sflag [#allocation3], %s269_s20 }
  0x5d   : > { %s273_s10 = scalar_lea.vmem [#allocation2], %s1519_s16  ;;  %s1756_s8 = scalar_lea.hbm %s2078_s23, 1792 }
  0x5e   : > { %s281_s11 = sshll.u32 %s273_s10, 4  ;;  %p1757_p7 = scmp.ne.s32.totalorder %s2078_s23, %s1756_s8  ;;  %s2084_s11 = int_to_ptr.vmem [resolvable:$true] %s281_s11 }
  0x5f   : > { %p1758_p9 = pneg %p2080_p11  ;;  %s1761_s21 = scalar_lea.hbm %s2232_s0, 3584 }
  0x60   : > { %p1762_p1 = scmp.lt.u32.totalorder %s2078_s23, %s2232_s0  ;;  %p1763_p2 = scmp.lt.u32.totalorder %s1761_s21, %s1756_s8 }
  0x61   : > { %p1759_p12 = pnand %p1758_p9, %p1757_p7  ;;  %p1765_p8 = scmp.lt.u32.totalorder %s1756_s8, %s2078_s23 }
  0x62   : > { %p1764_p4 = por %p1763_p2, %p1762_p1 }
  0x63   : > { %p1760_p0 = pneg %p1759_p12 }
  0x64   : > { %p1766_p13 = por %p1765_p8, %p1764_p4 }
  0x66   : > { %p1767_p6 = pnand %p1766_p13, %p1760_p0 }
  0x68   : > { %1770 = shalt.err (!%p1767_p6)
}
  0x69   : > { %s1771_s20 = scalar_lea.vmem %s2084_s11, 1792  ;;  %s1867_s16 = smov [#allocation2]  }
  0x6a   : > { %p1772_p10 = scmp.ne.s32.totalorder %s2084_s11, %s1771_s20  ;;  %s1776_s10 = sshll.u32 %s1867_s16, 4  ;;  %s1777_s10 = int_to_ptr.vmem [resolvable:$false] %s1776_s10 }
  0x6b   : > { %s1778_s12 = scalar_lea.vmem %s1777_s10, 3584  ;;  %p1779_p12 = scmp.lt.s32.totalorder %s2084_s11, %s1777_s10 }
  0x6c   : > { %p1774_p3 = pnand %p1772_p10, %p1758_p9  ;;  %p1780_p1 = scmp.lt.s32.totalorder %s1778_s12, %s1771_s20 }
  0x6e   : > { %p1775_p7 = pneg %p1774_p3  ;;  %p1781_p2 = por %p1780_p1, %p1779_p12 }
  0x70   : > { %p1782_p4 = pnand %p1781_p2, %p1775_p7 }
  0x72   : > { %1785 = shalt.err (!%p1782_p4)
}
  0x73   : > { %s1868_s8 = smov 896   ;;  %s1869_s17 = smov 56  }
  0x74   : > { %1551 = dma.hbm_to_vmem [thread:$0]  (!%p2080_p11), %s2078_s23, 1792, %s2084_s11, %s2086_s14, %s1868_s8, %s1868_s8, %s1869_s17  }
  0x75   : > { %p2253_p9 = scmp.ne.s32.totalorder %s2247_s9, 0 }
  0x76   : > { %s2117_s21 = sand.u32 (!%p2253_p9), 1, %s1852_s25   ;;  %p2254_p0 = scmp.ne.s32.totalorder (!%p2253_p9), %s2244_s30, 0 }
  0x77   : > { %293 = sbr.rel (%p2253_p9) target bundleno = 877 (0x36d), region = 48  ;;  %s296_s15 = scalar_lea.sflag (!%p2253_p9), [#allocation3], %s2117_s21 }
  0x78   : > { %s1521_s13 = smul.u32 (!%p2253_p9), 112, %s2117_s21 }
  0x7a   : > { %s2121_s20 = scalar_lea.vmem (!%p2253_p9), [#allocation2], %s1521_s13 }
  0x7e   : > { %1831 = dma.done.wait (%p2254_p0), %s296_s15, 1792  }
  0x7f   : > { %1833 = vsyncadd (%p2254_p0), %s296_s15, 4294965504  ;;  %p2255_p11 = scmp.eq.s32.totalorder %s1936_s28, 0 }
  0x81   : > { %1835 = dma.done.wait (%p2255_p11), [#allocation6], 7296   ;;  %p2256_p8 = pmov %p2255_p11 }
  0x83   : > { %1837 = vsyncadd (%p2256_p8), [#allocation6], 4294960000  ;;  %p2257_p13 = pmov %p2256_p8 }
  0x84   : > { %p2258_p6 = pmov %p2256_p8 }
  0x85   : > { %1839 = dma.done.wait (%p2257_p13), [#allocation9], 1024  }
  0x86   : > { %1841 = vsyncadd (%p2258_p6), [#allocation9], 4294966272  ;;  %v1607_v0 = vld [vmem:[#allocation5 + $0x40] sm:$0xff]   ;;  %v1611_v4 = vld [vmem:[#allocation5 + $0x48] sm:$0xff]   ;;  %v1870_v43 = vmov 0.0   ;;  %vm1871_vm0 = vmmov 0  }
  0x87   : > { %v1608_v1 = vld [vmem:[#allocation5] sm:$0xff]   ;;  %1387 = vmatprep.subr.bf16.mxu0 %v1607_v0  ;;  %v1612_v5 = vld [vmem:[#allocation5 + $0x8] sm:$0xff]   ;;  %v1615_v8 = vld [vmem:[#allocation5 + $0x50] sm:$0xff]   ;;  %vm765_vm1 = vcmask 130048   ;;  %s1302_s11 = sshll.u32 %s2117_s21, 3  ;;  %s1381_s8 = sshll.u32 %s1936_s28, 7 }
  0x88   : > { %v1609_v2 = vld [vmem:[#allocation5 + $0xc0] sm:$0xff]   ;;  %1388 = vmatpush3.bf16.msra.mxu0 %v1608_v1  ;;  %v1613_v6 = vld [vmem:[#allocation5 + $0xc8] sm:$0xff]   ;;  %v1616_v9 = vld [vmem:[#allocation5 + $0x10] sm:$0xff]   ;;  %s341_s10 = scalar_lea.vmem [#allocation10], %s1302_s11  ;;  %s2188_s15 = scalar_lea.hbm %s2239_s7, %s1381_s8 }
  0x89   : > { %v1610_v3 = vld [vmem:[#allocation5 + $0x80] sm:$0xff]   ;;  %1409 = vmatprep.subr.bf16.mxu1 %v1609_v2  ;;  %1389 = vmatprep.subr.bf16.mxu0 %v1611_v4  ;;  %v1614_v7 = vld [vmem:[#allocation5 + $0x88] sm:$0xff]   ;;  %v1617_v10 = vld [vmem:[#allocation5 + $0xd0] sm:$0xff]   ;;  %s1187_s12 = sshll.u32 %s341_s10, 4  ;;  %s1872_s28 = smov [#allocation10]   ;;  %s2183_s12 = int_to_ptr.vmem [resolvable:$true] %s1187_s12 }
  0x8a   : > { %1410 = vmatpush3.bf16.msra.mxu1 %v1610_v3  ;;  %v1618_v11 = vld [vmem:[#allocation5 + $0x90] sm:$0xff]   ;;  %v1619_v12 = vld [vmem:[#allocation5 + $0x58] sm:$0xff]   ;;  %v1623_v16 = vld [vmem:[#allocation5 + $0x60] sm:$0xff]   ;;  %s1786_s30 = scalar_lea.vmem %s2183_s12, 128  ;;  %s1790_s9 = sshll.u32 %s1872_s28, 4  ;;  %s1791_s9 = int_to_ptr.vmem [resolvable:$false] %s1790_s9 }
  0x8b   : > { %1411 = vmatprep.subr.bf16.mxu1 %v1613_v6  ;;  %v1620_v13 = vld [vmem:[#allocation5 + $0x18] sm:$0xff]   ;;  %v1624_v17 = vld [vmem:[#allocation5 + $0x20] sm:$0xff]   ;;  %v1627_v20 = vld [vmem:[#allocation5 + $0x68] sm:$0xff]   ;;  %p1787_p10 = scmp.ne.s32.totalorder %s2183_s12, %s1786_s30  ;;  %s1792_s23 = scalar_lea.vmem %s1791_s9, 256 }
  0x8c   : > { %1390 = vmatpush3.bf16.msra.mxu0 %v1612_v5  ;;  %v1621_v14 = vld [vmem:[#allocation5 + $0xd8] sm:$0xff]   ;;  %v1625_v18 = vld [vmem:[#allocation5 + $0xe0] sm:$0xff]   ;;  %v1628_v21 = vld [vmem:[#allocation5 + $0x28] sm:$0xff]   ;;  %p1793_p12 = scmp.lt.s32.totalorder %s2183_s12, %s1791_s9  ;;  %p1794_p1 = scmp.lt.s32.totalorder %s1792_s23, %s1786_s30 }
  0x8d   : > { %1391 = vmatprep.subr.bf16.mxu0 %v1615_v8  ;;  %v1622_v15 = vld [vmem:[#allocation5 + $0x98] sm:$0xff]   ;;  %v1626_v19 = vld [vmem:[#allocation5 + $0xa0] sm:$0xff]   ;;  %v1629_v22 = vld [vmem:[#allocation5 + $0xe8] sm:$0xff]   ;;  %p1788_p3 = pnand %p1787_p10, %p2069_p5 }
  0x8e   : > { %1412 = vmatpush3.bf16.msra.mxu1 %v1614_v7  ;;  %v1630_v23 = vld [vmem:[#allocation5 + $0xa8] sm:$0xff]   ;;  %v1631_v24 = vld [vmem:[#allocation5 + $0x70] sm:$0xff]   ;;  %v1635_v28 = vld [vmem:[#allocation5 + $0x78] sm:$0xff]   ;;  %p1795_p2 = por %p1794_p1, %p1793_p12 }
  0x8f   : > { %1413 = vmatprep.subr.bf16.mxu1 %v1617_v10  ;;  %v1632_v25 = vld [vmem:[#allocation5 + $0x30] sm:$0xff]   ;;  %v1636_v29 = vld [vmem:[#allocation5 + $0x38] sm:$0xff]   ;;  %v1639_v38 = vld [vmem:[#allocation5 + $0x140] sm:$0xff]   ;;  %p1789_p7 = pneg %p1788_p3 }
  0x90   : > { %1392 = vmatpush3.bf16.msra.mxu0 %v1616_v9  ;;  %v1633_v26 = vld [vmem:[#allocation5 + $0xf0] sm:$0xff]   ;;  %v1637_v30 = vld [vmem:[#allocation5 + $0xf8] sm:$0xff]   ;;  %v1640_v42 = vld [vmem:[#allocation5 + $0x100] sm:$0xff]  }
  0x91   : > { %1393 = vmatprep.subr.bf16.mxu0 %v1619_v12  ;;  %v1634_v27 = vld [vmem:[#allocation5 + $0xb0] sm:$0xff]   ;;  %v346_v31 = vld [vmem:[%s2121_s20 + $0x8] sm:$0xff]  ;;  %v352_v36 = vld [vmem:[%s2121_s20 + $0x38] sm:$0xff]  ;;  %p1796_p4 = pnand %p1795_p2, %p1789_p7 }
  0x92   : > { %1414 = vmatpush3.bf16.msra.mxu1 %v1618_v11  ;;  %v353_v32 = vld [vmem:[%s2121_s20 + $0x40] sm:$0xff]  ;;  %v1638_v34 = vld [vmem:[#allocation5 + $0xb8] sm:$0xff]   ;;  %v355_v40 = vld [vmem:[%s2121_s20 + $0x50] sm:$0xff] }
  0x93   : > { %1415 = vmatprep.subr.bf16.mxu1 %v1621_v14  ;;  %v360_v33 = vpack.c.bf16 %v353_v32, %v346_v31  ;;  %v345_v35 = vld [vmem:[%s2121_s20] sm:$0xff]  ;;  %v348_v39 = vld [vmem:[%s2121_s20 + $0x18] sm:$0xff]  ;;  %v347_v44 = vld [vmem:[%s2121_s20 + $0x10] sm:$0xff] }
  0x94   : > { %1394 = vmatpush3.bf16.msra.mxu0 %v1620_v13  ;;  %v359_v37 = vpack.c.bf16 %v352_v36, %v345_v35  ;;  %v362_v41 = vpack.c.bf16 %v355_v40, %v348_v39  ;;  %v354_v45 = vld [vmem:[%s2121_s20 + $0x48] sm:$0xff]  ;;  %v1643_v49 = vld [vmem:[#allocation5 + $0x150] sm:$0xff]   ;;  %v1647_v53 = vld [vmem:[#allocation5 + $0x160] sm:$0xff]  }
  0x95   : > { %1395 = vmatprep.subr.bf16.mxu0 %v1623_v16  ;;  %801 = vmatprep.mubr.bf16.mxu0 %v360_v33  ;;  %v361_v46 = vpack.c.bf16 %v354_v45, %v347_v44  ;;  %v1641_v47 = vld [vmem:[#allocation5 + $0x148] sm:$0xff]   ;;  %v1644_v50 = vld [vmem:[#allocation5 + $0x110] sm:$0xff]   ;;  %v1645_v51 = vld [vmem:[#allocation5 + $0x158] sm:$0xff]  }
  0x96   : > { %1416 = vmatpush3.bf16.msra.mxu1 %v1622_v15  ;;  %842 = vmatprep.mubr.bf16.mxu1 %v362_v41  ;;  %v1642_v48 = vld [vmem:[#allocation5 + $0x108] sm:$0xff]   ;;  %v1646_v52 = vld [vmem:[#allocation5 + $0x118] sm:$0xff]   ;;  %v1648_v54 = vld [vmem:[#allocation5 + $0x120] sm:$0xff]  }
  0x97   : > { %1417 = vmatprep.subr.bf16.mxu1 %v1625_v18  ;;  %v1649_v55 = vld [vmem:[#allocation5 + $0x168] sm:$0xff]   ;;  %v1655_v56 = vld [vmem:[#allocation5 + $0x180] sm:$0xff]   ;;  %v1651_v59 = vld [vmem:[#allocation5 + $0x170] sm:$0xff]  }
  0x98   : > { %1396 = vmatpush3.bf16.msra.mxu0 %v1624_v17  ;;  %v350_v57 = vld [vmem:[%s2121_s20 + $0x28] sm:$0xff]  ;;  %v357_v60 = vld [vmem:[%s2121_s20 + $0x60] sm:$0xff]  ;;  %v351_v62 = vld [vmem:[%s2121_s20 + $0x30] sm:$0xff] }
  0x99   : > { %1397 = vmatprep.subr.bf16.mxu0 %v1627_v20  ;;  %v1650_v58 = vld [vmem:[#allocation5 + $0x128] sm:$0xff]   ;;  %v364_v61 = vpack.c.bf16 %v357_v60, %v350_v57  ;;  %v1652_v1 = vld [vmem:[#allocation5 + $0x130] sm:$0xff]   ;;  %v1653_v2 = vld [vmem:[#allocation5 + $0x178] sm:$0xff]  }
  0x9a   : > { %1418 = vmatpush3.bf16.msra.mxu1 %v1626_v19  ;;  %v358_v63 = vld [vmem:[%s2121_s20 + $0x68] sm:$0xff]  ;;  %v349_v4 = vld [vmem:[%s2121_s20 + $0x20] sm:$0xff]  ;;  %v356_v5 = vld [vmem:[%s2121_s20 + $0x58] sm:$0xff]  ;;  %s1174_s20 = scalar_lea.sflag [#allocation4], %s2117_s21 }
  0x9b   : > { %1419 = vmatprep.subr.bf16.mxu1 %v1629_v22  ;;  %v365_v0 = vpack.c.bf16 %v358_v63, %v351_v62  ;;  %v1654_v3 = vld [vmem:[#allocation5 + $0x138] sm:$0xff]   ;;  %v363_v6 = vpack.c.bf16 %v356_v5, %v349_v4  ;;  %v1656_v7 = vld [vmem:[#allocation7] sm:$0xff]   ;;  %v1657_v8 = vld [vmem:[#allocation7 + $0x8] sm:$0xff]  }
  0x9c   : > { %1398 = vmatpush3.bf16.msra.mxu0 %v1628_v21  ;;  %v1658_v9 = vld [vmem:[#allocation7 + $0x10] sm:$0xff]   ;;  %v1659_v10 = vld [vmem:[#allocation7 + $0x18] sm:$0xff]   ;;  %v1660_v11 = vld [vmem:[#allocation7 + $0x20] sm:$0xff]  }
  0x9d   : > { %1399 = vmatprep.subr.bf16.mxu0 %v1631_v24  ;;  %v1661_v12 = vld [vmem:[#allocation7 + $0x28] sm:$0xff]   ;;  %v1662_v13 = vld [vmem:[#allocation7 + $0x30] sm:$0xff]   ;;  %v1663_v14 = vld [vmem:[#allocation7 + $0x38] sm:$0xff]  }
  0x9e   : > { %1420 = vmatpush3.bf16.msra.mxu1 %v1630_v23  ;;  %v1664_v15 = vld [vmem:[#allocation8] sm:$0xff]   ;;  %v1665_v16 = vld [vmem:[#allocation8 + $0x8] sm:$0xff]   ;;  %v1666_v17 = vld [vmem:[#allocation8 + $0x10] sm:$0xff]  }
  0x9f   : > { %1421 = vmatprep.subr.bf16.mxu1 %v1633_v26  ;;  %v1667_v18 = vld [vmem:[#allocation8 + $0x18] sm:$0xff]   ;;  %v1668_v19 = vld [vmem:[#allocation8 + $0x20] sm:$0xff]   ;;  %v1669_v20 = vld [vmem:[#allocation8 + $0x28] sm:$0xff]  }
  0xa0   : > { %1400 = vmatpush3.bf16.msra.mxu0 %v1632_v25  ;;  %v1303_v22 = vld [vmem:[%s2234_s2] ss:$0 sm:$0xff] }
  0xa1   : > { %1401 = vmatprep.subr.bf16.mxu0 %v1635_v28  ;;  %v1671_v57 = vld [vmem:[#allocation8 + $0x38] sm:$0xff]  }
  0xa2   : > { %1422 = vmatpush3.bf16.msra.mxu1 %v1634_v27 }
  0xa3   : > { %1423 = vmatprep.subr.bf16.mxu1 %v1637_v30 }
  0xa4   : > { %1402 = vmatpush3.bf16.msra.mxu0 %v1636_v29 }
  0xa5   : > { %1431 = vmatprep.subr.bf16.mxu0 %v1639_v38 }
  0xa6   : > { %1424 = vmatpush3.bf16.msra.mxu1 %v1638_v34 }
  0xa7   : > { %1473 = vmatprep.subr.bf16.mxu1 %v1870_v43  ;;  %802 = vmatmul.mubr.bf16.vlgmr.msra.gmra.mrb[0].mxu0 %v359_v37 }
  0xa8   : > { %1432 = vmatpush3.bf16.msra.mxu0 %v1640_v42  ;;  %883 = vmatprep.mubr.bf16.mxu0 %v364_v61 }
  0xa9   : > { %843 = vmatmul.mubr.bf16.vlgmr.msra.gmra.mrb[0].mxu1 %v361_v46  ;;  %1433 = vmatprep.subr.bf16.mxu0 %v1641_v47 }
  0xaa   : > { %1475 = vmatprep.mubr.msk.bf16.mxu1 %vm1871_vm0, %v1870_v43  ;;  %1474 = vmatpush3.bf16.msra.mxu1 %v1655_v56  ;;  %v1670_v56 = vld [vmem:[#allocation8 + $0x30] sm:$0xff]  }
  0xab   : > { %1479 = vmatprep.subr.bf16.mxu1 %v1870_v43 }
  0xac   : > { %1434 = vmatpush3.bf16.msra.mxu0 %v1642_v48 }
  0xad   : > { %1435 = vmatprep.subr.bf16.mxu0 %v1643_v49 }
  0xb0   : > { %1436 = vmatpush3.bf16.msra.mxu0 %v1644_v50 }
  0xb1   : > { %1437 = vmatprep.subr.bf16.mxu0 %v1645_v51  ;;  %1476 = vmatmul.mubr.msk.bf16.vlgmr.msra.gmra.mrb[4].mxu1 %vm765_vm1, %v365_v0 }
  0xb2   : > { %1495 = vmatprep.mubr.msk.bf16.mxu1 %vm1871_vm0, %v1870_v43  ;;  %1480 = vmatpush3.bf16.msra.mxu1 %v1656_v7 }
  0xb3   : > { %1481 = vmatprep.subr.bf16.mxu1 %v1870_v43 }
  0xb4   : > { %1438 = vmatpush3.bf16.msra.mxu0 %v1646_v52 }
  0xb5   : > { %1439 = vmatprep.subr.bf16.mxu0 %v1647_v53 }
  0xb6   : > { %1482 = vmatpush3.bf16.msra.mxu1 %v1657_v8 }
  0xb7   : > { %1483 = vmatprep.subr.bf16.mxu1 %v1870_v43 }
  0xb8   : > { %1440 = vmatpush3.bf16.msra.mxu0 %v1648_v54 }
  0xb9   : > { %1441 = vmatprep.subr.bf16.mxu0 %v1649_v55 }
  0xba   : > { %1484 = vmatpush3.bf16.msra.mxu1 %v1658_v9 }
  0xbb   : > { %1485 = vmatprep.subr.bf16.mxu1 %v1870_v43 }
  0xbc   : > { %1442 = vmatpush3.bf16.msra.mxu0 %v1650_v58  ;;  %v1354_v58 = vld [vmem:[%s2236_s4] ss:$0 sm:$0xff] }
  0xbd   : > { %1443 = vmatprep.subr.bf16.mxu0 %v1651_v59 }
  0xbe   : > { %1486 = vmatpush3.bf16.msra.mxu1 %v1659_v10 }
  0xbf   : > { %1487 = vmatprep.subr.bf16.mxu1 %v1870_v43 }
  0xc0   : > { %1444 = vmatpush3.bf16.msra.mxu0 %v1652_v1 }
  0xc1   : > { %1445 = vmatprep.subr.bf16.mxu0 %v1653_v2 }
  0xc2   : > { %1488 = vmatpush3.bf16.msra.mxu1 %v1660_v11 }
  0xc3   : > { %1489 = vmatprep.subr.bf16.mxu1 %v1870_v43 }
  0xc4   : > { %1446 = vmatpush3.bf16.msra.mxu0 %v1654_v3 }
  0xc5   : > { %1499 = vmatprep.subr.bf16.mxu0 %v1870_v43 }
  0xc6   : > { %1490 = vmatpush3.bf16.msra.mxu1 %v1661_v12 }
  0xc7   : > { %884 = vmatmul.mubr.bf16.vlgmr.msra.gmra.mrb[4].mxu0 %v363_v6  ;;  %1491 = vmatprep.subr.bf16.mxu1 %v1870_v43 }
  0xc8   : > { %1515 = vmatprep.mubr.msk.bf16.mxu0 %vm1871_vm0, %v1870_v43  ;;  %1500 = vmatpush3.bf16.msra.mxu0 %v1664_v15 }
  0xc9   : > { %1501 = vmatprep.subr.bf16.mxu0 %v1870_v43 }
  0xca   : > { %1492 = vmatpush3.bf16.msra.mxu1 %v1662_v13 }
  0xcb   : > { %1493 = vmatprep.subr.bf16.mxu1 %v1870_v43 }
  0xcc   : > { %1502 = vmatpush3.bf16.msra.mxu0 %v1665_v16 }
  0xcd   : > { %1503 = vmatprep.subr.bf16.mxu0 %v1870_v43 }
  0xce   : > { %1494 = vmatpush3.bf16.msra.mxu1 %v1663_v14 }
  0xd0   : > { %1504 = vmatpush3.bf16.msra.mxu0 %v1666_v17 }
  0xd1   : > { %1505 = vmatprep.subr.bf16.mxu0 %v1870_v43 }
  0xd4   : > { %1506 = vmatpush3.bf16.msra.mxu0 %v1667_v18 }
  0xd5   : > { %1507 = vmatprep.subr.bf16.mxu0 %v1870_v43 }
  0xd8   : > { %1508 = vmatpush3.bf16.msra.mxu0 %v1668_v19 }
  0xd9   : > { %1509 = vmatprep.subr.bf16.mxu0 %v1870_v43 }
  0xdc   : > { %1510 = vmatpush3.bf16.msra.mxu0 %v1669_v20 }
  0xdd   : > { %1511 = vmatprep.subr.bf16.mxu0 %v1870_v43 }
  0xe0   : > { %1512 = vmatpush3.bf16.msra.mxu0 %v1670_v56 }
  0xe1   : > { %1513 = vmatprep.subr.bf16.mxu0 %v1870_v43  ;;  %v1363_v43 = vld [vmem:[%s2238_s6] ss:$0 sm:$0xff] }
  0xe4   : > { %1514 = vmatpush3.bf16.msra.mxu0 %v1671_v57 }
 0x17a   : > { %v1403_v21 = vpop.f32.mrb[0].mxu0 }
 0x17b   : > { %v1404_v23 = vpop.f32.mrb[1].mxu0 }
 0x17c   : > { %v1405_v24 = vadd.f32 %v1404_v23, %v1403_v21  ;;  %v1406_v25 = vpop.f32.mrb[2].mxu0  ;;  %v1425_v26 = vpop.f32.mrb[0].mxu1 }
 0x17d   : > { %v1407_v27 = vpop.f32.mrb[3].mxu0  ;;  %v1426_v30 = vpop.f32.mrb[1].mxu1 }
 0x17e   : > { %v804_v28 = vadd.f32 %v1405_v24, %v1303_v22  ;;  %v1408_v29 = vadd.f32 %v1407_v27, %v1406_v25  ;;  %v1427_v31 = vadd.f32 %v1426_v30, %v1425_v26  ;;  %v1428_v32 = vpop.f32.mrb[2].mxu1 }
 0x17f   : > { %v1429_v34 = vpop.f32.mrb[3].mxu1 }
 0x180   : > { %v807_v33 = vadd.f32 %v1408_v29, %v1303_v22  ;;  %v845_v35 = vadd.f32 %v1427_v31, %v804_v28  ;;  %v1430_v36 = vadd.f32 %v1429_v34, %v1428_v32 }
 0x182   : > { %v848_v37 = vadd.f32 %v1430_v36, %v807_v33 }
 0x184   : > { %v926_v38 = vpop.f32.mrb[4].mxu1 }
 0x185   : > { %v1477_v39 = vpop.f32.mrb[5].mxu1 }
 0x186   : > { %v929_v40 = vpop.f32.mrb[6].mxu1 }
 0x187   : > { %v1478_v41 = vpop.f32.mrb[7].mxu1 }
 0x19a   : > { %v1447_v42 = vpop.f32.mrb[4].mxu0 }
 0x19b   : > { %v1448_v44 = vpop.f32.mrb[5].mxu0 }
 0x19c   : > { %v1449_v45 = vadd.f32 %v1448_v44, %v1447_v42  ;;  %v1450_v46 = vpop.f32.mrb[6].mxu0 }
 0x19d   : > { %v1451_v47 = vpop.f32.mrb[7].mxu0 }
 0x19e   : > { %v886_v48 = vadd.f32 %v1449_v45, %v845_v35  ;;  %v1452_v49 = vadd.f32 %v1451_v47, %v1450_v46 }
 0x1a0   : > { %v927_v50 = vadd.f32 %v926_v38, %v886_v48  ;;  %v889_v51 = vadd.f32 %v1452_v49, %v848_v37 }
 0x1a2   : > { %v930_v52 = vadd.f32 %v929_v40, %v889_v51  ;;  %v933_v53 = vmax.f32 %v927_v50, 0.0 }
 0x1a4   : > { %v934_v54 = vmax.f32 %v930_v52, 0.0 }
 0x1a6   : > { %v935_v55 = vpack.c.bf16 %v934_v54, %v933_v53 }
 0x1a8   : > { %1496 = vmatmul.mubr.bf16.vlgmr.msra.gmra.mrb[8].mxu1 %v935_v55 }
 0x27b   : > { %v1041_v59 = vpop.f32.mrb[8].mxu1 }
 0x27c   : > { %v1042_v60 = vadd.f32 %v1354_v58, %v1041_v59  ;;  %v1497_v61 = vpop.f32.mrb[9].mxu1 }
 0x27d   : > { %v1044_v62 = vpop.f32.mrb[10].mxu1 }
 0x27e   : > { %v1045_v63 = vadd.f32 %v1354_v58, %v1044_v62  ;;  %v1498_v0 = vpop.f32.mrb[11].mxu1  ;;  %v1048_v1 = vmax.f32 %v1042_v60, 0.0 }
 0x280   : > { %v1049_v2 = vmax.f32 %v1045_v63, 0.0 }
 0x282   : > { %v1050_v3 = vpack.c.bf16 %v1049_v2, %v1048_v1 }
 0x284   : > { %1516 = vmatmul.mubr.bf16.vlgmr.msra.gmra.mrb[8].mxu0 %v1050_v3 }
 0x357   : > { %v1156_v4 = vpop.f32.mrb[8].mxu0 }
 0x358   : > { %v1517_v5 = vpop.f32.mrb[9].mxu0  ;;  %v1157_v7 = vadd.f32 %v1363_v43, %v1156_v4 }
 0x359   : > { %v1159_v6 = vpop.f32.mrb[10].mxu0 }
 0x35a   : > { %v1160_v8 = vadd.f32 %v1363_v43, %v1159_v6  ;;  %v1518_v9 = vpop.f32.mrb[11].mxu0 }
 0x35c   : > { %v1385_v10 = vpack.c.bf16 %v1160_v8, %v1157_v7 }
 0x35e   : > { %1386 = vst [vmem:[%s341_s10] sm:$0xff] %v1385_v10  }
 0x35f   : > { %1799 = shalt.err (!%p1796_p4)
}
 0x360   : > { %s1800_s29 = scalar_lea.hbm %s2188_s15, 128  ;;  %s1804_s16 = scalar_lea.hbm %s2239_s7, 256 }
 0x361   : > { %p1801_p9 = scmp.ne.s32.totalorder %s2188_s15, %s1800_s29  ;;  %p1805_p8 = scmp.lt.u32.totalorder %s2188_s15, %s2239_s7 }
 0x362   : > { %p1806_p13 = scmp.lt.u32.totalorder %s1804_s16, %s1800_s29  ;;  %p1808_p10 = scmp.lt.u32.totalorder %s1800_s29, %s2188_s15 }
 0x363   : > { %p1802_p0 = pnand %p1801_p9, %p2069_p5 }
 0x364   : > { %p1807_p6 = por %p1806_p13, %p1805_p8 }
 0x365   : > { %p1803_p11 = pneg %p1802_p0 }
 0x366   : > { %p1809_p3 = por %p1808_p10, %p1807_p6 }
 0x368   : > { %p1810_p7 = pnand %p1809_p3, %p1803_p11 }
 0x36a   : > { %1813 = shalt.err (!%p1810_p7)
}
 0x36b   : > { %s1873_s17 = smov 64   ;;  %s1874_s13 = smov 4  }
 0x36c   : > { %1536 = dma.vmem_to_hbm [thread:$0]  (%p2069_p5), %s2183_s12, 128, %s2188_s15, %s1174_s20, %s1873_s17, %s1873_s17, %s1874_s13  }
 0x36d PF: > { %s2259_s30 = sld [smem:[#allocation15_spill]]  ;;  %s1202_s28 = sand.u32 1, %s1848_s24  }
 0x36e   : > { %p2261_p1 = scmp.ge.s32.totalorder %s1860_s27, 2  ;;  %s1203_s9 = scalar_lea.sflag [#allocation4], %s1202_s28 }
 0x373   : > { %p2260_p12 = scmp.ne.s32.totalorder %s2259_s30, 0 }
 0x375   : > { %p1553_p2 = pnand %p2261_p1, %p2260_p12 }
 0x377   : > { %1843 = dma.done.wait (!%p1553_p2), %s1203_s9, 128  }
 0x378   : > { %1845 = vsyncadd (!%p1553_p2), %s1203_s9, 4294967168  ;;  %p22_p4 = scmp.ge.s32.totalorder %s2055_s22, 4   ;;  %s2262_s24 = smov %s1852_s25 }
 0x379   : > { %s2263_s25 = smov %s1856_s26  ;;  %s2264_s26 = smov %s2065_s18 }
 0x37a   : > { %s2265_s27 = smov %s2055_s22  ;;  %24 = sbr.rel (!%p22_p4) target bundleno = 7 (0x7), region = 105 }
 0x381   :  { %1208 = vsyncpa [#allocation3], 1 }
 0x382   :  { %1210 = vsyncpa [#allocation3 + $0x1], 1 }
 0x383   :  { %1211 = vsyncpa [#allocation6], 1 }
 0x384   :  { %1212 = vsyncpa [#allocation9], 1 }
 0x385   :  { %1213 = vsyncpa [#allocation4], 1 }
 0x386   :  { %1215 = vsyncpa [#allocation4 + $0x1], 1 }

</bundles_post_ra>
